<compile_context>
chip_gen: v7x
topology: tpu7x:2x2x1
jax: 0.10.0
libtpu: 0.0.40
codegen_flags: <defaults>
</compile_context>

<pallas_src>
import jax
import jax.numpy as jnp
from jax.experimental import pallas as pl
from jax.experimental.pallas import tpu as pltpu

LANE = 128
SUBLANE = 8


def _cdiv(a, b):
    return (a + b - 1) // b


def poly_linear_kernel(x_ref, w_ref, b_ref, o_ref):
    # x_ref: VMEM (3, R, 128) -- feature-major; batch dense on (sublane, lane)
    # w_ref: SMEM (3,)        -- Linear weights as resident scalars
    # b_ref: SMEM (1,)        -- bias scalar
    # o_ref: VMEM (R, 128)    -- dense output block (unmasked full-lane stores)
    x0 = x_ref[0]  # (R, 128)
    x1 = x_ref[1]
    x2 = x_ref[2]
    # 3 VPU FMAs + bias; no MXU, no transpose, no masked stores.
    o_ref[...] = x0 * w_ref[0] + x1 * w_ref[1] + x2 * w_ref[2] + b_ref[0]


def poly_model_forward(x, w, b, *, tile_rows=4096):
    """Forward of poly_model: out = x @ w.T + b  (nn.Linear(3, 1) semantics).

    x: (N, 3) float32, w: (1, 3), b: (1, 1) or (1,).  Returns (N, 1) float32.
    """
    N, K = x.shape
    assert K == 3 and w.shape == (1, 3)

    # --- static tiling of the batch axis onto (rows x 128 lanes) -------------
    m = _cdiv(N, LANE)                          # rows of 128 batch elements
    n_steps = _cdiv(m, tile_rows)               # grid length
    # Balance rows across steps (padding waste < ~8 rows/step), rounded up to a
    # sublane multiple so blocks satisfy the (8, 128) layout rule.
    rows_per_step = _cdiv(_cdiv(m, n_steps), SUBLANE) * SUBLANE
    m_pad = n_steps * rows_per_step
    n_pad = m_pad * LANE

    # --- layout plumbing (single fused pad-of-transpose) ---------------------
    x_f = x.astype(jnp.float32)
    xT = x_f.T                                   # (3, N) feature-major
    if n_pad != N:
        xT = jnp.pad(xT, ((0, 0), (0, n_pad - N)))
    x3 = xT.reshape(3, m_pad, LANE)

    w_flat = w.reshape(3).astype(jnp.float32)
    b_flat = jnp.asarray(b).reshape(-1)[:1].astype(jnp.float32)

    out = pl.pallas_call(
        poly_linear_kernel,
        out_shape=jax.ShapeDtypeStruct((m_pad, LANE), jnp.float32),
        grid=(n_steps,),
        in_specs=[
            pl.BlockSpec((3, rows_per_step, LANE), lambda i: (0, i, 0)),  # features
            pl.BlockSpec(memory_space=pltpu.MemorySpace.SMEM),            # weights
            pl.BlockSpec(memory_space=pltpu.MemorySpace.SMEM),            # bias
        ],
        out_specs=pl.BlockSpec((rows_per_step, LANE), lambda i: (i, 0)),
        compiler_params=pltpu.CompilerParams(
            dimension_semantics=("parallel",),      # shards across TCs on v7x
            vmem_limit_bytes=32 * 1024 * 1024,      # raise v5e's 16 MiB scoped default
        ),
    )(x3, w_flat, b_flat)

    # Undo layout plumbing: (m_pad, 128) -> (N, 1).  Padded lanes hold `b` and
    # are sliced off here.
    return out.reshape(-1)[:N].reshape(N, 1)


if __name__ == "__main__":
    key = jax.random.PRNGKey(0)
    k_x, k_w, k_b = jax.random.split(key, 3)

    # Small batch of polynomial features [x, x^2, x^3], consistent with Linear(3, 1).
    N = 8
    base = jax.random.normal(k_x, (N, 1), dtype=jnp.float32)
    x = jnp.concatenate([base, base**2, base**3], axis=1)      # (N, 3)

    # Deterministic parameter init mimicking nn.Linear default U[-1/sqrt(3), 1/sqrt(3)].
    bound = 1.0 / jnp.sqrt(3.0)
    w = jax.random.uniform(k_w, (1, 3), dtype=jnp.float32, minval=-bound, maxval=bound)
    b = jax.random.uniform(k_b, (1, 1), dtype=jnp.float32, minval=-bound, maxval=bound)

    out = poly_model_forward(x, w, b)
    jax.block_until_ready(out)

    # Reference in plain JAX (same semantics as PyTorch nn.Linear forward).
    ref = x @ w.T + b
    assert out.shape == (N, 1)
    assert jnp.allclose(out, ref, atol=1e-5, rtol=1e-5)

    print("KERNEL_OK")
</pallas_src>

<mosaic_0001>
module attributes {stable_mosaic.version = 11 : i64} {
  func.func @poly_linear_kernel(%arg0: i32, %arg1: memref<3x8x128xf32, #tpu.memory_space<vmem>>, %arg2: memref<3xf32, #tpu.memory_space<smem>>, %arg3: memref<1xf32, #tpu.memory_space<smem>>, %arg4: memref<8x128xf32, #tpu.memory_space<vmem>>) attributes {dimension_semantics = [#tpu.dimension_semantics<parallel>], iteration_bounds = array<i64: 1>, scalar_prefetch = 0 : i64, scratch_operands = 0 : i64, tpu.core_type = #tpu.core_type<tc>, window_params = [{transform_indices = @transform_0, window_bounds = array<i64: 3, 8, 128>}, {transform_indices = @transform_1, window_bounds = array<i64: 3>}, {transform_indices = @transform_2, window_bounds = array<i64: 1>}, {transform_indices = @transform_3, window_bounds = array<i64: 8, 128>}]} {
    %c0 = arith.constant 0 : index
    %c0_0 = arith.constant 0 : index
    %c0_1 = arith.constant 0 : index
    %0 = vector.load %arg1[%c0, %c0_0, %c0_1] : memref<3x8x128xf32, #tpu.memory_space<vmem>>, vector<1x8x128xf32>
    %1 = vector.shape_cast %0 : vector<1x8x128xf32> to vector<8x128xf32>
    %c1 = arith.constant 1 : index
    %c0_2 = arith.constant 0 : index
    %c0_3 = arith.constant 0 : index
    %2 = vector.load %arg1[%c1, %c0_2, %c0_3] : memref<3x8x128xf32, #tpu.memory_space<vmem>>, vector<1x8x128xf32>
    %3 = vector.shape_cast %2 : vector<1x8x128xf32> to vector<8x128xf32>
    %c2 = arith.constant 2 : index
    %c0_4 = arith.constant 0 : index
    %c0_5 = arith.constant 0 : index
    %4 = vector.load %arg1[%c2, %c0_4, %c0_5] : memref<3x8x128xf32, #tpu.memory_space<vmem>>, vector<1x8x128xf32>
    %5 = vector.shape_cast %4 : vector<1x8x128xf32> to vector<8x128xf32>
    %c0_6 = arith.constant 0 : index
    %6 = memref.load %arg2[%c0_6] : memref<3xf32, #tpu.memory_space<smem>>
    %7 = vector.broadcast %6 : f32 to vector<8x128xf32>
    %8 = arith.mulf %1, %7 : vector<8x128xf32>
    %c1_7 = arith.constant 1 : index
    %9 = memref.load %arg2[%c1_7] : memref<3xf32, #tpu.memory_space<smem>>
    %10 = vector.broadcast %9 : f32 to vector<8x128xf32>
    %11 = arith.mulf %3, %10 : vector<8x128xf32>
    %12 = arith.addf %8, %11 : vector<8x128xf32>
    %c2_8 = arith.constant 2 : index
    %13 = memref.load %arg2[%c2_8] : memref<3xf32, #tpu.memory_space<smem>>
    %14 = vector.broadcast %13 : f32 to vector<8x128xf32>
    %15 = arith.mulf %5, %14 : vector<8x128xf32>
    %16 = arith.addf %12, %15 : vector<8x128xf32>
    %c0_9 = arith.constant 0 : index
    %17 = memref.load %arg3[%c0_9] : memref<1xf32, #tpu.memory_space<smem>>
    %18 = vector.broadcast %17 : f32 to vector<8x128xf32>
    %19 = arith.addf %16, %18 : vector<8x128xf32>
    %c0_10 = arith.constant 0 : index
    %c0_11 = arith.constant 0 : index
    %20 = vector.load %arg4[%c0_10, %c0_11] : memref<8x128xf32, #tpu.memory_space<vmem>>, vector<8x128xf32>
    tpu.vector_store %arg4[%c0_10, %c0_11], %19 {strides = array<i32>} : memref<8x128xf32, #tpu.memory_space<vmem>>, vector<8x128xf32>,
    return
  }
  func.func @transform_0(%arg0: i32) -> (i32, i32, i32) {
    %c0_i32 = arith.constant 0 : i32
    %c0_i32_0 = arith.constant 0 : i32
    %c0_i32_1 = arith.constant 0 : i32
    return %c0_i32, %arg0, %c0_i32_0 : i32, i32, i32
  }
  func.func @transform_1(%arg0: i32) -> i32 {
    %c0_i32 = arith.constant 0 : i32
    %c0_i32_0 = arith.constant 0 : i32
    return %c0_i32 : i32
  }
  func.func @transform_2(%arg0: i32) -> i32 {
    %c0_i32 = arith.constant 0 : i32
    %c0_i32_0 = arith.constant 0 : i32
    return %c0_i32 : i32
  }
  func.func @transform_3(%arg0: i32) -> (i32, i32) {
    %c0_i32 = arith.constant 0 : i32
    %c0_i32_0 = arith.constant 0 : i32
    return %arg0, %c0_i32 : i32, i32
  }
}

</mosaic_0001>

<bundles_post_ra>
// kernel: tpu_custom_call.1
= control target key start
LH: loop header
LB: loop body
LE: loop exit
PB: predicated region body
PF: predicated region fallthrough
CT: control target
= control target key end

     0   :  { %9 = vsyncpa [#allocation4], 0  ;;  %s203_s0 = inlined_call_operand.hbm [shape: f32[3,8,128], index: 0, kind: input, shape index: {}]   ;;  %s204_s1 = inlined_call_operand.vmem [shape: f32[3], index: 1, kind: input, shape index: {}]   ;;  %s205_s2 = inlined_call_operand.<no memory space> [shape: f32[1], index: 2, kind: input, shape index: {}]   ;;  %s206_s3 = inlined_call_operand.hbm [shape: f32[8,128], index: 3, kind: output, shape index: {}]  }
   0x1   :  { %10 = vsyncpa [#allocation6], 0 }
   0x2   :  { %11 = vsyncpa [#allocation5], 0  ;;  %s148_s12 = smov [#allocation3]   ;;  %s30_s16 = sshll.u32 %s204_s1, 4  ;;  %s31_s16 = int_to_ptr.vmem [resolvable:$true] %s30_s16 }
   0x3   :  { %s17_s13 = sshll.u32 %s148_s12, 4  ;;  %s86_s19 = scalar_lea.hbm %s203_s0, 384  ;;  %s18_s13 = int_to_ptr.vmem [resolvable:$true] %s17_s13 }
   0x4   :  { %p87_p0 = scmp.ne.s32.totalorder %s203_s0, %s86_s19  ;;  %p90_p1 = scmp.lt.u32.totalorder %s86_s19, %s203_s0 }
   0x6   :  { %p92_p2 = pnand %p90_p1, %p87_p0 }
   0x8   :  { %95 = shalt.err (!%p92_p2)
}
   0x9   :  { %s96_s24 = scalar_lea.vmem %s18_s13, 384  ;;  %p101_p4 = scmp.lt.s32.totalorder %s18_s13, %s18_s13 }
   0xa   :  { %p97_p3 = scmp.ne.s32.totalorder %s18_s13, %s96_s24  ;;  %p102_p5 = scmp.lt.s32.totalorder %s96_s24, %s96_s24 }
   0xc   :  { %p103_p6 = por %p102_p5, %p101_p4 }
   0xe   :  { %p104_p7 = pnand %p103_p6, %p97_p3 }
  0x10   :  { %107 = shalt.err (!%p104_p7)
}
  0x11   :  { %s149_s1 = smov 128   ;;  %s150_s25 = smov 8  }
  0x12   :  { %23 = dma.hbm_to_vmem [thread:$0]  %s203_s0, 384, %s18_s13, [#allocation4], %s149_s1, %s149_s1, %s150_s25  }
  0x13   :  { %s108_s28 = scalar_lea.vmem %s31_s16, 16  ;;  %p113_p9 = scmp.lt.s32.totalorder %s31_s16, %s31_s16 }
  0x14   :  { %p109_p8 = scmp.ne.s32.totalorder %s31_s16, %s108_s28  ;;  %p114_p10 = scmp.lt.s32.totalorder %s108_s28, %s108_s28 }
  0x16   :  { %p115_p11 = por %p114_p10, %p113_p9 }
  0x18   :  { %p116_p12 = pnand %p115_p11, %p109_p8 }
  0x1a   :  { %119 = shalt.err (!%p116_p12)
}
  0x1b   :  { %s151_s29 = smov [#allocation7]  }
  0x1c   :  { %33 = dma.vmem_to_smem %s31_s16, 16, %s151_s29, [#allocation6]  }
  0x1d   :  { %142 = dma.done.wait [#allocation4], 384  }
  0x1e   :  { %143 = vsyncadd [#allocation4], 4294966912 }
  0x1f   :  { %144 = dma.done.wait [#allocation6], 16  }
  0x20   :  { %145 = vsyncadd [#allocation6], 4294967280 }
  0x21   :  { %42 = sfence }
  0x22   :  { %s48_s30 = sld [smem:[#allocation7]]  ;;  %s79_s4 = sld [smem:[#allocation7 + $0x1]]  ;;  %v43_v0 = vld [vmem:[#allocation3] sm:$0xff]  ;;  %v45_v1 = vld [vmem:[#allocation3 + $0x8] sm:$0xff]  ;;  %v47_v2 = vld [vmem:[#allocation3 + $0x10] sm:$0xff]  ;;  %v60_v10 = vstv %s205_s2 }
  0x23   :  { %s80_s5 = sld [smem:[#allocation7 + $0x2]]  ;;  %s152_s7 = smov [#allocation8]  }
  0x24   :  { %s69_s8 = sshll.u32 %s152_s7, 4  ;;  %s70_s8 = int_to_ptr.vmem [resolvable:$true] %s69_s8 }
  0x25   :  { %s120_s9 = scalar_lea.vmem %s70_s8, 128  ;;  %p125_p0 = scmp.lt.s32.totalorder %s70_s8, %s70_s8 }
  0x26   :  { %p121_p13 = scmp.ne.s32.totalorder %s70_s8, %s120_s9  ;;  %p126_p1 = scmp.lt.s32.totalorder %s120_s9, %s120_s9 }
  0x28   :  { %v49_v3 = vstv %s48_s30  ;;  %v52_v5 = vstv %s79_s4  ;;  %p127_p2 = por %p126_p1, %p125_p0 }
  0x29   :  { %v50_v4 = vmul.f32 %v49_v3, %v43_v0  ;;  %v56_v6 = vstv %s80_s5  ;;  %v53_v7 = vmul.f32 %v52_v5, %v45_v1 }
  0x2a   :  { %v57_v8 = vmul.f32 %v56_v6, %v47_v2  ;;  %p128_p3 = pnand %p127_p2, %p121_p13 }
  0x2b   :  { %v54_v9 = vadd.f32 %v53_v7, %v50_v4 }
  0x2d   :  { %v58_v11 = vadd.f32 %v57_v8, %v54_v9 }
  0x2f   :  { %v61_v12 = vadd.f32 %v60_v10, %v58_v11 }
  0x31   :  { %62 = vst [vmem:[#allocation8] sm:$0xff] %v61_v12 }
  0x32   :  { %131 = shalt.err (!%p128_p3)
}
  0x33   :  { %s132_s12 = scalar_lea.hbm %s206_s3, 128 }
  0x34   :  { %p133_p4 = scmp.ne.s32.totalorder %s206_s3, %s132_s12  ;;  %p136_p5 = scmp.lt.u32.totalorder %s132_s12, %s206_s3 }
  0x36   :  { %p138_p6 = pnand %p136_p5, %p133_p4 }
  0x38   :  { %141 = shalt.err (!%p138_p6)
}
  0x39   :  { %72 = dma.vmem_to_hbm [thread:$0]  %s70_s8, 128, %s206_s3, [#allocation5]  }
  0x3a   :  { %146 = dma.done.wait [#allocation5], 128  }
  0x3b   :  { %147 = vsyncadd [#allocation5], 4294967168 }
  0x3c   :  { %76 = vsyncpa [#allocation4], 1 }
  0x3d   :  { %77 = vsyncpa [#allocation5], 1 }
  0x3e   :  { %78 = vsyncpa [#allocation6], 1 }

</bundles_post_ra>
